<compile_context>
chip_gen: v7x
topology: tpu7x:2x2x1
jax: 0.10.0
libtpu: 0.0.40
codegen_flags: <defaults>
</compile_context>

<pallas_src>
import jax
import jax.numpy as jnp
from jax.experimental import pallas as pl
from jax.experimental.pallas import tpu as pltpu

C_PAD = 128  # lane-dense class dimension


def _round_up(x, m):
    return -(-x // m) * m


# ---------------------------------------------------------------------------
# Kernels
# ---------------------------------------------------------------------------
def _linear_kernel_single(x_ref, w_ref, b_ref, o_ref):
    """Single K block: one (TM, D) x (D, 128) MXU matmul + broadcast bias."""
    o_ref[...] = (
        jnp.dot(x_ref[...], w_ref[...], preferred_element_type=jnp.float32)
        + b_ref[...]
    ).astype(o_ref.dtype)


def _linear_kernel_ktiled(x_ref, w_ref, b_ref, o_ref, acc_ref):
    """K-tiled path: accumulate partial (TM, 128) products in f32 scratch."""
    k = pl.program_id(1)

    @pl.when(k == 0)
    def _init():
        acc_ref[...] = jnp.zeros_like(acc_ref)

    acc_ref[...] += jnp.dot(
        x_ref[...], w_ref[...], preferred_element_type=jnp.float32)

    @pl.when(k == pl.num_programs(1) - 1)
    def _finalize():
        o_ref[...] = (acc_ref[...] + b_ref[...]).astype(o_ref.dtype)


# ---------------------------------------------------------------------------
# Parameter prep (one-time, NOT per forward)
# ---------------------------------------------------------------------------
def prepare_params(weight, bias, c_pad=C_PAD, param_dtype=None):
    """Transpose PyTorch-layout weight (C, D) -> (D, C) and zero-pad the
    class (lane) dimension to 128; bias -> (1, 128) kept in f32 for the
    epilogue add.

    param_dtype=jnp.bfloat16 halves the resident-weight VMEM/HBM footprint
    (the kernel keeps preferred_element_type=f32); leave None for exact f32
    parity with the PyTorch reference.
    """
    c, d = weight.shape
    if param_dtype is not None:
        weight = weight.astype(param_dtype)
    w_t = jnp.zeros((d, c_pad), weight.dtype).at[:, :c].set(weight.T)
    b = jnp.zeros((1, c_pad), jnp.float32).at[0, :c].set(
        bias.astype(jnp.float32))
    return w_t, b


# ---------------------------------------------------------------------------
# Tiling / VMEM budget
# ---------------------------------------------------------------------------
def _vmem_budget_bytes():
    """~70% of physical VMEM, floor 32 MiB, cap 100 MiB (consistent budget
    for tile selection AND vmem_limit_bytes)."""
    try:
        info = pltpu.get_tpu_info()
        phys = int(getattr(info, "vmem_capacity_bytes", 64 << 20))
    except Exception:  # conservative (v7x-sized) default
        phys = 64 << 20
    return int(min(max((phys * 7) // 10, 32 << 20), 100 << 20))


def _pick_tiles(n, d, x_bytes, w_bytes, budget):
    """Choose (tm, tk, k_tiles) under the VMEM budget.

    Per-step residency:
      weight block : tk*128*w_bytes   (x1 buffer if K-invariant, else x2)
      x block      : tm*tk*x_bytes    (x2, streamed)
      out block    : tm*128*4         (x2, streamed)
      accumulator  : tm*128*4         (K-tiled path only)
      bias         : 128*4
    """
    n8 = max(8, _round_up(n, 8))

    # --- K (feature) axis ---------------------------------------------------
    w_budget = budget // 3
    if d * C_PAD * w_bytes <= w_budget:
        tk, k_tiles = d, 1
        w_resident = d * C_PAD * w_bytes            # single-buffered
    else:
        tk = 0
        for mult in range(d // 128, 0, -1):          # largest 128-mult divisor
            t = mult * 128
            if d % t == 0 and 2 * t * C_PAD * w_bytes <= w_budget:
                tk = t
                break
        if tk == 0:
            # TODO(synk): D not a multiple of 128 (or budget tiny) -- fall
            # back to one resident block; zero-pad D in prepare_params if
            # this ever triggers for real workloads.
            tk, k_tiles = d, 1
            w_resident = d * C_PAD * w_bytes
        else:
            k_tiles = d // tk
            w_resident = 2 * tk * C_PAD * w_bytes    # double-buffered stream

    # --- batch (M) axis -----------------------------------------------------
    fixed = w_resident + C_PAD * 4
    per_row = 2 * tk * x_bytes + 2 * C_PAD * 4
    if k_tiles > 1:
        per_row += C_PAD * 4                         # accumulator scratch
    tm = (budget - fixed) // max(per_row, 1)
    tm = max(8, min(int(tm), 1024))                  # 512-1024 ~ HBM roofline
    if n8 >= 16:
        # Guarantee >= 2 batch steps so ("parallel",) uses both v7x TCs and
        # the DMA pipeline has something to overlap with.
        tm = min(tm, _round_up(-(-n8 // 2), 8))
    tm = max(8, (tm // 8) * 8)
    tm = min(tm, n8)
    return tm, tk, k_tiles


def _block_spec(shape, index_map, single_buffer=False):
    """BlockSpec; pin grid-invariant operands to one VMEM buffer when the
    installed JAX supports pipeline_mode (halves resident weight VMEM)."""
    if single_buffer:
        try:
            return pl.BlockSpec(shape, index_map, pipeline_mode=pl.Buffered(1))
        except (TypeError, ValueError, AttributeError):
            pass
    return pl.BlockSpec(shape, index_map)


# ---------------------------------------------------------------------------
# Forward
# ---------------------------------------------------------------------------
def softmax_regression_forward(x, w_padded, b_padded, num_outputs):
    """Forward matching the PyTorch module.

    x:        (N, ...) - flattened to (N, D) like inputs.view(N, -1)
    w_padded: (D, 128) from prepare_params (weight.T, lane-padded)
    b_padded: (1, 128) float32 from prepare_params
    returns:  (N, num_outputs) float32 logits
    """
    n = x.shape[0]
    x2 = x.reshape(n, -1)                       # inputs.view(N, -1)
    d = x2.shape[1]
    c_pad = w_padded.shape[1]
    assert w_padded.shape[0] == d

    budget = _vmem_budget_bytes()
    tm, tk, k_tiles = _pick_tiles(
        n, d, x2.dtype.itemsize, w_padded.dtype.itemsize, budget)
    grid_m = -(-n // tm)                        # ragged last block, no jnp.pad
    grid = (grid_m, k_tiles)

    if k_tiles == 1:
        kernel = _linear_kernel_single
        w_spec = _block_spec((tk, c_pad), lambda i, k: (0, 0),
                             single_buffer=True)      # resident, 1 buffer
        scratch = []
    else:
        kernel = _linear_kernel_ktiled
        w_spec = pl.BlockSpec((tk, c_pad), lambda i, k: (k, 0))  # streamed
        scratch = [pltpu.VMEM((tm, c_pad), jnp.float32)]

    out = pl.pallas_call(
        kernel,
        out_shape=jax.ShapeDtypeStruct((n, c_pad), jnp.float32),
        grid_spec=pltpu.PrefetchScalarGridSpec(
            num_scalar_prefetch=0,
            grid=grid,
            in_specs=[
                pl.BlockSpec((tm, tk), lambda i, k: (i, k)),     # streamed x
                w_spec,                                          # weight
                _block_spec((1, c_pad), lambda i, k: (0, 0),
                            single_buffer=True),                 # bias
            ],
            out_specs=pl.BlockSpec((tm, c_pad), lambda i, k: (i, 0)),
            scratch_shapes=scratch,
        ),
        compiler_params=pltpu.CompilerParams(
            dimension_semantics=("parallel", "arbitrary"),
            vmem_limit_bytes=budget,
        ),
        cost_estimate=pl.CostEstimate(
            flops=2 * n * d * c_pad,
            bytes_accessed=(x2.size * x2.dtype.itemsize
                            + w_padded.size * w_padded.dtype.itemsize
                            + b_padded.size * 4
                            + n * c_pad * 4),
            transcendentals=0,
        ),
    )(x2, w_padded, b_padded)

    # Drop the lane-padded class columns (batch is already exact).
    return out[:, :num_outputs]
    # TODO(synk): in a real training loop, fuse the downstream softmax /
    # cross-entropy into the finalize step (EUP exp slot is idle here) and
    # emit bf16 logits to shrink output HBM traffic.


if __name__ == "__main__":
    # Small shapes consistent with the module: (N, C, H, W) images flattened
    # to num_inputs = C*H*W features, num_outputs classes.
    N, C_in, H, W = 8, 1, 16, 16
    num_inputs = C_in * H * W                   # 256
    num_outputs = 10

    key = jax.random.PRNGKey(0)
    k_x, k_w, k_b = jax.random.split(key, 3)

    x = jax.random.normal(k_x, (N, C_in, H, W), dtype=jnp.float32)
    bound = 1.0 / (num_inputs ** 0.5)           # nn.Linear default init scale
    weight = jax.random.uniform(
        k_w, (num_outputs, num_inputs), minval=-bound, maxval=bound,
        dtype=jnp.float32)
    bias = jax.random.uniform(
        k_b, (num_outputs,), minval=-bound, maxval=bound, dtype=jnp.float32)

    # One-time parameter prep (transpose + lane-pad), outside the forward.
    w_padded, b_padded = prepare_params(weight, bias)

    out = softmax_regression_forward(x, w_padded, b_padded, num_outputs)
    out = jax.block_until_ready(out)

    # Reference check against plain JAX (TPU default matmul precision).
    ref = x.reshape(N, -1) @ weight.T + bias
    assert out.shape == (N, num_outputs), out.shape
    assert jnp.allclose(out, ref, atol=1e-2, rtol=1e-2), float(
        jnp.max(jnp.abs(out - ref)))

    print("KERNEL_OK")
</pallas_src>

<mosaic_0001>
module attributes {stable_mosaic.version = 11 : i64} {
  func.func @_linear_kernel_single(%arg0: i32, %arg1: i32, %arg2: memref<8x256xf32, #tpu.memory_space<vmem>>, %arg3: memref<256x128xf32, #tpu.memory_space<vmem>>, %arg4: memref<1x128xf32, #tpu.memory_space<vmem>>, %arg5: memref<8x128xf32, #tpu.memory_space<vmem>>) attributes {dimension_semantics = [#tpu.dimension_semantics<parallel>, #tpu.dimension_semantics<arbitrary>], iteration_bounds = array<i64: 1, 1>, scalar_prefetch = 0 : i64, scratch_operands = 0 : i64, tpu.core_type = #tpu.core_type<tc>, window_params = [{transform_indices = @transform_0, window_bounds = array<i64: 8, 256>}, {pipeline_mode = #tpu.pipeline_mode<synchronous>, transform_indices = @transform_1, window_bounds = array<i64: 256, 128>}, {pipeline_mode = #tpu.pipeline_mode<synchronous>, transform_indices = @transform_2, window_bounds = array<i64: 1, 128>}, {transform_indices = @transform_3, window_bounds = array<i64: 8, 128>}]} {
    %c0 = arith.constant 0 : index
    %c0_0 = arith.constant 0 : index
    %0 = vector.load %arg2[%c0, %c0_0] : memref<8x256xf32, #tpu.memory_space<vmem>>, vector<8x256xf32>
    %c0_1 = arith.constant 0 : index
    %c0_2 = arith.constant 0 : index
    %1 = vector.load %arg3[%c0_1, %c0_2] : memref<256x128xf32, #tpu.memory_space<vmem>>, vector<256x128xf32>
    %cst = arith.constant dense<0.000000e+00> : vector<8x128xf32>
    %2 = tpu.matmul %0, %1, %cst {dimension_numbers = #tpu.dot_dimension_numbers<[1], [0], [0], [1], [0, 0, 1, 1], [], []>} : vector<8x256xf32>, vector<256x128xf32>, vector<8x128xf32> -> vector<8x128xf32>
    %c0_3 = arith.constant 0 : index
    %c0_4 = arith.constant 0 : index
    %3 = vector.load %arg4[%c0_3, %c0_4] : memref<1x128xf32, #tpu.memory_space<vmem>>, vector<1x128xf32>
    %4 = vector.broadcast %3 : vector<1x128xf32> to vector<8x128xf32>
    %5 = arith.addf %2, %4 : vector<8x128xf32>
    %c0_5 = arith.constant 0 : index
    %c0_6 = arith.constant 0 : index
    %6 = vector.load %arg5[%c0_5, %c0_6] : memref<8x128xf32, #tpu.memory_space<vmem>>, vector<8x128xf32>
    tpu.vector_store %arg5[%c0_5, %c0_6], %5 {strides = array<i32>} : memref<8x128xf32, #tpu.memory_space<vmem>>, vector<8x128xf32>,
    return
  }
  func.func @transform_0(%arg0: i32, %arg1: i32) -> (i32, i32) {
    %c0_i32 = arith.constant 0 : i32
    return %arg0, %arg1 : i32, i32
  }
  func.func @transform_1(%arg0: i32, %arg1: i32) -> (i32, i32) {
    %c0_i32 = arith.constant 0 : i32
    %c0_i32_0 = arith.constant 0 : i32
    %c0_i32_1 = arith.constant 0 : i32
    return %c0_i32, %c0_i32_0 : i32, i32
  }
  func.func @transform_2(%arg0: i32, %arg1: i32) -> (i32, i32) {
    %c0_i32 = arith.constant 0 : i32
    %c0_i32_0 = arith.constant 0 : i32
    %c0_i32_1 = arith.constant 0 : i32
    return %c0_i32, %c0_i32_0 : i32, i32
  }
  func.func @transform_3(%arg0: i32, %arg1: i32) -> (i32, i32) {
    %c0_i32 = arith.constant 0 : i32
    %c0_i32_0 = arith.constant 0 : i32
    return %arg0, %c0_i32 : i32, i32
  }
}

</mosaic_0001>

<bundles_post_ra>
// kernel: tpu_custom_call.1
= control target key start
LH: loop header
LB: loop body
LE: loop exit
PB: predicated region body
PF: predicated region fallthrough
CT: control target
= control target key end

     0   :  { %8 = vsyncpa [#allocation3], 0  ;;  %s385_s0 = inlined_call_operand.hbm [shape: f32[8,256], index: 0, kind: input, shape index: {}]   ;;  %s386_s1 = inlined_call_operand.hbm [shape: f32[256,128], index: 1, kind: input, shape index: {}]   ;;  %s387_s2 = inlined_call_operand.vmem [shape: f32[1,128], index: 2, kind: input, shape index: {}]   ;;  %s388_s3 = inlined_call_operand.hbm [shape: f32[8,128], index: 3, kind: output, shape index: {}]  }
   0x1   :  { %9 = vsyncpa [#allocation6], 0 }
   0x2   :  { %10 = vsyncpa [#allocation4], 0  ;;  %s314_s12 = smov [#allocation2]   ;;  %s315_s14 = smov [#allocation5]  }
   0x3   :  { %s17_s13 = sshll.u32 %s314_s12, 4  ;;  %s26_s15 = sshll.u32 %s315_s14, 4  ;;  %s18_s13 = int_to_ptr.vmem [resolvable:$true] %s17_s13  ;;  %s339_s15 = int_to_ptr.vmem [resolvable:$true] %s26_s15 }
   0x4   :  { %s242_s18 = scalar_lea.hbm %s385_s0, 256 }
   0x5   :  { %p243_p0 = scmp.ne.s32.totalorder %s385_s0, %s242_s18  ;;  %p246_p1 = scmp.lt.u32.totalorder %s242_s18, %s385_s0 }
   0x7   :  { %p248_p2 = pnand %p246_p1, %p243_p0 }
   0x9   :  { %251 = shalt.err (!%p248_p2)
}
   0xa   :  { %s252_s23 = scalar_lea.vmem %s18_s13, 256  ;;  %p257_p4 = scmp.lt.s32.totalorder %s18_s13, %s18_s13 }
   0xb   :  { %p253_p3 = scmp.ne.s32.totalorder %s18_s13, %s252_s23  ;;  %p258_p5 = scmp.lt.s32.totalorder %s252_s23, %s252_s23 }
   0xd   :  { %p259_p6 = por %p258_p5, %p257_p4 }
   0xf   :  { %p260_p7 = pnand %p259_p6, %p253_p3 }
  0x11   :  { %263 = shalt.err (!%p260_p7)
}
  0x12   :  { %20 = dma.hbm_to_vmem [thread:$0]  %s385_s0, 256, %s18_s13, [#allocation3]  }
  0x13   :  { %s264_s28 = scalar_lea.hbm %s386_s1, 4096 }
  0x14   :  { %p265_p8 = scmp.ne.s32.totalorder %s386_s1, %s264_s28  ;;  %p268_p9 = scmp.lt.u32.totalorder %s264_s28, %s386_s1 }
  0x16   :  { %p270_p10 = pnand %p268_p9, %p265_p8 }
  0x18   :  { %273 = shalt.err (!%p270_p10)
}
  0x19   :  { %s274_s6 = scalar_lea.vmem %s339_s15, 4096  ;;  %p279_p12 = scmp.lt.s32.totalorder %s339_s15, %s339_s15 }
  0x1a   :  { %p275_p11 = scmp.ne.s32.totalorder %s339_s15, %s274_s6  ;;  %p280_p13 = scmp.lt.s32.totalorder %s274_s6, %s274_s6 }
  0x1c   :  { %p281_p0 = por %p280_p13, %p279_p12 }
  0x1e   :  { %p282_p1 = pnand %p281_p0, %p275_p11 }
  0x20   :  { %285 = shalt.err (!%p282_p1)
}
  0x21   :  { %s316_s0 = smov 128   ;;  %s317_s7 = smov 8  }
  0x22   :  { %32 = dma.hbm_to_vmem [thread:$0]  %s386_s1, 4096, %s339_s15, [#allocation6], %s316_s0, %s316_s0, %s317_s7  }
  0x23   :  { %308 = dma.done.wait [#allocation3], 256  }
  0x24   :  { %309 = vsyncadd [#allocation3], 4294967040 }
  0x25   :  { %310 = dma.done.wait [#allocation6], 4096  }
  0x26   :  { %311 = vsyncadd [#allocation6], 4294963200  ;;  %v59_v0 = vld [vmem:[#allocation5 + $0x80] sm:$0xff]  ;;  %v60_v1 = vld [vmem:[#allocation5 + $0x88] sm:$0xff]  ;;  %s318_s11 = smov [#allocation7]  }
  0x27   :  { %v43_v2 = vld [vmem:[#allocation5] sm:$0xff]  ;;  %v205_v3 = vpack.c.bf16 %v60_v1, %v59_v0  ;;  %v44_v4 = vld [vmem:[#allocation5 + $0x8] sm:$0xff]  ;;  %v61_v5 = vld [vmem:[#allocation5 + $0x90] sm:$0xff]  ;;  %s159_s12 = sshll.u32 %s318_s11, 4  ;;  %s160_s12 = int_to_ptr.vmem [resolvable:$true] %s159_s12 }
  0x28   :  { %v62_v6 = vld [vmem:[#allocation5 + $0x98] sm:$0xff]  ;;  %v207_v7 = vpack.c.bf16 %v44_v4, %v43_v2  ;;  %v45_v9 = vld [vmem:[#allocation5 + $0x10] sm:$0xff]  ;;  %v63_v11 = vld [vmem:[#allocation5 + $0xa0] sm:$0xff]  ;;  %s286_s13 = scalar_lea.vmem %s160_s12, 128  ;;  %p291_p3 = scmp.lt.s32.totalorder %s160_s12, %s160_s12 }
  0x29   :  { %v209_v8 = vpack.c.bf16 %v62_v6, %v61_v5  ;;  %v46_v10 = vld [vmem:[#allocation5 + $0x18] sm:$0xff]  ;;  %206 = vmatprep.subr.bf16.mxu0 %v205_v3  ;;  %v64_v12 = vld [vmem:[#allocation5 + $0xa8] sm:$0xff]  ;;  %v47_v15 = vld [vmem:[#allocation5 + $0x20] sm:$0xff]  ;;  %p287_p2 = scmp.ne.s32.totalorder %s160_s12, %s286_s13  ;;  %p292_p4 = scmp.lt.s32.totalorder %s286_s13, %s286_s13 }
  0x2a   :  { %208 = vmatpush3.bf16.msra.mxu0 %v207_v7  ;;  %v211_v13 = vpack.c.bf16 %v46_v10, %v45_v9  ;;  %v213_v14 = vpack.c.bf16 %v64_v12, %v63_v11  ;;  %v48_v16 = vld [vmem:[#allocation5 + $0x28] sm:$0xff]  ;;  %v65_v17 = vld [vmem:[#allocation5 + $0xb0] sm:$0xff]  ;;  %v66_v18 = vld [vmem:[#allocation5 + $0xb8] sm:$0xff] }
  0x2b   :  { %210 = vmatprep.subr.bf16.mxu0 %v209_v8  ;;  %v215_v19 = vpack.c.bf16 %v48_v16, %v47_v15  ;;  %v217_v20 = vpack.c.bf16 %v66_v18, %v65_v17  ;;  %v49_v21 = vld [vmem:[#allocation5 + $0x30] sm:$0xff]  ;;  %v50_v22 = vld [vmem:[#allocation5 + $0x38] sm:$0xff]  ;;  %v67_v23 = vld [vmem:[#allocation5 + $0xc0] sm:$0xff]  ;;  %p293_p5 = por %p292_p4, %p291_p3 }
  0x2c   :  { %v68_v24 = vld [vmem:[#allocation5 + $0xc8] sm:$0xff]  ;;  %v42_v25 = vld [vmem:[#allocation2 + $0x8] sm:$0xff]  ;;  %v219_v26 = vpack.c.bf16 %v50_v22, %v49_v21  ;;  %v51_v28 = vld [vmem:[#allocation5 + $0x40] sm:$0xff] }
  0x2d   :  { %146 = vmatprep.mubr.f32.mxu0 %v42_v25  ;;  %v221_v27 = vpack.c.bf16 %v68_v24, %v67_v23  ;;  %v52_v29 = vld [vmem:[#allocation5 + $0x48] sm:$0xff]  ;;  %v69_v30 = vld [vmem:[#allocation5 + $0xd0] sm:$0xff]  ;;  %v70_v31 = vld [vmem:[#allocation5 + $0xd8] sm:$0xff]  ;;  %p294_p6 = pnand %p293_p5, %p287_p2 }
  0x2e   :  { %212 = vmatpush3.bf16.msra.mxu0 %v211_v13  ;;  %v223_v32 = vpack.c.bf16 %v52_v29, %v51_v28  ;;  %v225_v33 = vpack.c.bf16 %v70_v31, %v69_v30  ;;  %v53_v34 = vld [vmem:[#allocation5 + $0x50] sm:$0xff]  ;;  %v54_v35 = vld [vmem:[#allocation5 + $0x58] sm:$0xff]  ;;  %v71_v36 = vld [vmem:[#allocation5 + $0xe0] sm:$0xff] }
  0x2f   :  { %214 = vmatprep.subr.bf16.mxu0 %v213_v14  ;;  %v72_v37 = vld [vmem:[#allocation5 + $0xe8] sm:$0xff]  ;;  %v227_v38 = vpack.c.bf16 %v54_v35, %v53_v34  ;;  %v55_v40 = vld [vmem:[#allocation5 + $0x60] sm:$0xff]  ;;  %v73_v42 = vld [vmem:[#allocation5 + $0xf0] sm:$0xff] }
  0x30   :  { %v229_v39 = vpack.c.bf16 %v72_v37, %v71_v36  ;;  %v56_v41 = vld [vmem:[#allocation5 + $0x68] sm:$0xff]  ;;  %v74_v43 = vld [vmem:[#allocation5 + $0xf8] sm:$0xff]  ;;  %v57_v46 = vld [vmem:[#allocation5 + $0x70] sm:$0xff] }
  0x31   :  { %v231_v44 = vpack.c.bf16 %v56_v41, %v55_v40  ;;  %v233_v45 = vpack.c.bf16 %v74_v43, %v73_v42  ;;  %v58_v47 = vld [vmem:[#allocation5 + $0x78] sm:$0xff]  ;;  %v41_v49 = vld [vmem:[#allocation2] sm:$0xff] }
  0x32   :  { %216 = vmatpush3.bf16.msra.mxu0 %v215_v19  ;;  %v235_v48 = vpack.c.bf16 %v58_v47, %v57_v46  ;;  %v169_v51 = vld [vmem:[%s387_s2] ss:$0 sm:$0xff] }
  0x33   :  { %218 = vmatprep.subr.bf16.mxu0 %v217_v20 }
  0x36   :  { %220 = vmatpush3.bf16.msra.mxu0 %v219_v26 }
  0x37   :  { %222 = vmatprep.subr.bf16.mxu0 %v221_v27 }
  0x3a   :  { %224 = vmatpush3.bf16.msra.mxu0 %v223_v32 }
  0x3b   :  { %226 = vmatprep.subr.bf16.mxu0 %v225_v33 }
  0x3e   :  { %228 = vmatpush3.bf16.msra.mxu0 %v227_v38 }
  0x3f   :  { %230 = vmatprep.subr.bf16.mxu0 %v229_v39 }
  0x42   :  { %232 = vmatpush3.bf16.msra.mxu0 %v231_v44 }
  0x43   :  { %234 = vmatprep.subr.bf16.mxu0 %v233_v45 }
  0x46   :  { %236 = vmatpush3.bf16.msra.mxu0 %v235_v48 }
  0x49   :  { %147 = vmatmul.mubr.f32.vlgmr.msra.gmra.mrb[0].mxu0 %v41_v49 }
 0x11c   :  { %v202_v50 = vpop.f32.mrb[0].mxu0 }
 0x11d   :  { %v203_v52 = vpop.f32.mrb[1].mxu0 }
 0x11e   :  { %v204_v53 = vadd.f32 %v203_v52, %v202_v50 }
 0x120   :  { %v149_v54 = vadd.f32 %v204_v53, %v169_v51 }
 0x122   :  { %152 = vst [vmem:[#allocation7] sm:$0xff] %v149_v54 }
 0x123   :  { %297 = shalt.err (!%p294_p6)
}
 0x124   :  { %s298_s16 = scalar_lea.hbm %s388_s3, 128 }
 0x125   :  { %p299_p7 = scmp.ne.s32.totalorder %s388_s3, %s298_s16  ;;  %p302_p8 = scmp.lt.u32.totalorder %s298_s16, %s388_s3 }
 0x127   :  { %p304_p9 = pnand %p302_p8, %p299_p7 }
 0x129   :  { %307 = shalt.err (!%p304_p9)
}
 0x12a   :  { %162 = dma.vmem_to_hbm [thread:$0]  %s160_s12, 128, %s388_s3, [#allocation4]  }
 0x12b   :  { %312 = dma.done.wait [#allocation4], 128  }
 0x12c   :  { %313 = vsyncadd [#allocation4], 4294967168 }
 0x12d   :  { %166 = vsyncpa [#allocation3], 1 }
 0x12e   :  { %167 = vsyncpa [#allocation6], 1 }
 0x12f   :  { %168 = vsyncpa [#allocation4], 1 }

</bundles_post_ra>
